<compile_context>
chip_gen: v5e
topology: v5e:2x2
jax: 0.10.0
libtpu: 0.0.40
codegen_flags: <defaults>
</compile_context>

<pallas_src>
import math

import jax
import jax.numpy as jnp
from jax.experimental import pallas as pl
from jax.experimental.pallas import tpu as pltpu

_VMEM_LIMIT_BYTES = 48 * 1024 * 1024  # safe on v5e/v6e (128 MiB) and v7x (64 MiB)


def _round_up(x, m):
    return (x + m - 1) // m * m


def _pad2(a, rows, cols):
    r, c = a.shape
    return jnp.pad(a, ((0, rows - r), (0, cols - c)))


# ---------------------------------------------------------------------------
# Planning / graph preparation (pay the adj pad+cast once per graph)
# ---------------------------------------------------------------------------
def make_plan(n, f_in, f_out, compute_dtype=jnp.bfloat16):
    """Tiling / padding plan for a GCN layer (n, f_in) -> (n, f_out)."""
    itemsize = jnp.dtype(compute_dtype).itemsize
    f_in_pad = _round_up(f_in, 128)
    f_out_pad = _round_up(f_out, 128)
    n_pad = _round_up(n, 128)

    # Fused single-kernel path: whole problem + support scratch fits VMEM.
    fused_bytes = (
        2 * (n_pad * n_pad + n_pad * f_in_pad + f_in_pad * f_out_pad) * itemsize
        + 2 * n_pad * f_out_pad * 4          # f32 output (double buffered)
        + n_pad * f_out_pad * itemsize       # support scratch
        + 2 * f_out_pad * 4                  # bias
    )
    if n_pad <= 1024 and fused_bytes <= 20 * 1024 * 1024:
        return dict(
            fused=True, n=n, f_in=f_in, f_out=f_out,
            compute_dtype=compute_dtype,
            n_rows_pad=n_pad, n_cols_pad=n_pad,
            f_in_pad=f_in_pad, f_out_pad=f_out_pad,
        )

    # Tiled two-stage path.
    tm = 512                                   # output-row tile (stage 2)
    tk = 2048 if itemsize <= 2 else 1024       # adj-column (contraction) tile
    tk = min(tk, _round_up(n, 512))            # avoid huge padding on modest n
    n_rows_pad = _round_up(n, tm)
    n_cols_pad = _round_up(n, tk)

    if f_out_pad <= 1024:                      # f_out tile (v7x VMEM safety)
        tn = f_out_pad
    else:
        tn = 512
        f_out_pad = _round_up(f_out_pad, tn)

    if f_in_pad <= 1024:                       # stage-1 contraction tile
        tk1 = f_in_pad
    else:
        tk1 = 512
        f_in_pad = _round_up(f_in_pad, tk1)
    tm1 = min(512, n_cols_pad)

    return dict(
        fused=False, n=n, f_in=f_in, f_out=f_out,
        compute_dtype=compute_dtype,
        n_rows_pad=n_rows_pad, n_cols_pad=n_cols_pad,
        f_in_pad=f_in_pad, f_out_pad=f_out_pad,
        tm=tm, tk=tk, tn=tn, tm1=tm1, tk1=tk1,
    )


def prepare_adj(adj, plan):
    """Pad + cast the dense adjacency once per graph; reuse across layers."""
    n = plan["n"]
    assert adj.shape == (n, n)
    return _pad2(adj.astype(plan["compute_dtype"]),
                 plan["n_rows_pad"], plan["n_cols_pad"])


# ---------------------------------------------------------------------------
# Kernels
# ---------------------------------------------------------------------------
def _fused_kernel(x_ref, w_ref, adj_ref, b_ref, o_ref, s_ref):
    # support = x @ W kept resident in VMEM scratch (no HBM round trip).
    s_ref[...] = jnp.dot(
        x_ref[...], w_ref[...], preferred_element_type=jnp.float32
    ).astype(s_ref.dtype)
    # out = adj @ support + bias  (f32 accumulation on the MXU).
    o_ref[...] = (
        jnp.dot(adj_ref[...], s_ref[...], preferred_element_type=jnp.float32)
        + b_ref[...]
    ).astype(o_ref.dtype)


def _support_kernel(x_ref, w_ref, o_ref):
    # Whole f_in contraction fits in one block.
    o_ref[...] = jnp.dot(
        x_ref[...], w_ref[...], preferred_element_type=jnp.float32
    ).astype(o_ref.dtype)


def _support_kernel_ktiled(x_ref, w_ref, o_ref, acc_ref):
    # f_in (contraction) tiled: f32 accumulator scratch, bf16/f32 store at end.
    k = pl.program_id(2)
    partial = jnp.dot(x_ref[...], w_ref[...], preferred_element_type=jnp.float32)

    @pl.when(k == 0)
    def _():
        acc_ref[...] = partial

    @pl.when(k > 0)
    def _():
        acc_ref[...] += partial

    @pl.when(k == pl.num_programs(2) - 1)
    def _():
        o_ref[...] = acc_ref[...].astype(o_ref.dtype)


def _aggregate_kernel(adj_ref, s_ref, b_ref, o_ref):
    # out(i, j) = sum_k adj(i, k) @ support(k, j) + bias(j)
    # Output tile is f32 and resident across k (constant block index), so we
    # accumulate directly into it — no scratch, no extra copy / store slots.
    k = pl.program_id(2)
    partial = jnp.dot(adj_ref[...], s_ref[...], preferred_element_type=jnp.float32)

    @pl.when(k == 0)
    def _():
        o_ref[...] = partial + b_ref[...]       # bias folded into first step

    @pl.when(k > 0)
    def _():
        o_ref[...] += partial


# ---------------------------------------------------------------------------
# Public forward
# ---------------------------------------------------------------------------
def graph_convolution(x, adj, weight, bias=None, *,
                      compute_dtype=jnp.bfloat16, plan=None, adj_prepared=None):
    """GCN layer: out = adj @ (x @ weight) + bias, returned as float32.

    `plan` (make_plan) and `adj_prepared` (prepare_adj) can be computed once
    per graph and reused across layers/steps so the n^2 pad/cast of adj is
    not repaid on every call.  compute_dtype (default bf16) is the matmul
    operand dtype; accumulation is always f32.
    """
    n, f_in = x.shape
    f_out = weight.shape[1]
    if plan is None:
        plan = make_plan(n, f_in, f_out, compute_dtype)
    cd = plan["compute_dtype"]
    assert plan["n"] == n and plan["f_in"] == f_in and plan["f_out"] == f_out

    if adj_prepared is None:
        adj_prepared = prepare_adj(adj, plan)

    f_in_pad, f_out_pad = plan["f_in_pad"], plan["f_out_pad"]
    n_rows_pad, n_cols_pad = plan["n_rows_pad"], plan["n_cols_pad"]

    xp = _pad2(x.astype(cd), n_cols_pad, f_in_pad)
    wp = _pad2(weight.astype(cd), f_in_pad, f_out_pad)
    if bias is None:
        bp = jnp.zeros((1, f_out_pad), jnp.float32)
    else:
        bp = _pad2(bias.astype(jnp.float32).reshape(1, f_out), 1, f_out_pad)

    # ----------------- Fused single-kernel path (small graphs) --------------
    if plan["fused"]:
        n_pad = n_rows_pad
        out = pl.pallas_call(
            _fused_kernel,
            out_shape=jax.ShapeDtypeStruct((n_pad, f_out_pad), jnp.float32),
            grid=(1,),
            in_specs=[
                pl.BlockSpec((n_pad, f_in_pad), lambda i: (0, 0)),      # x
                pl.BlockSpec((f_in_pad, f_out_pad), lambda i: (0, 0)),  # W
                pl.BlockSpec((n_pad, n_pad), lambda i: (0, 0)),         # adj
                pl.BlockSpec((1, f_out_pad), lambda i: (0, 0)),         # bias
            ],
            out_specs=pl.BlockSpec((n_pad, f_out_pad), lambda i: (0, 0)),
            scratch_shapes=[pltpu.VMEM((n_pad, f_out_pad), cd)],
            compiler_params=pltpu.CompilerParams(
                dimension_semantics=("arbitrary",),
                vmem_limit_bytes=_VMEM_LIMIT_BYTES,
            ),
        )(xp, wp, adj_prepared, bp)
        return out[:n, :f_out]

    # ----------------- Tiled two-stage path (large graphs) ------------------
    tm, tk, tn = plan["tm"], plan["tk"], plan["tn"]
    tm1, tk1 = plan["tm1"], plan["tk1"]
    itemsize = jnp.dtype(cd).itemsize

    # Stage 1: support = x @ W  (rows tiled; f_in contraction tiled if large)
    gi1, gj1, gk1 = n_cols_pad // tm1, f_out_pad // tn, f_in_pad // tk1
    common1 = dict(
        out_shape=jax.ShapeDtypeStruct((n_cols_pad, f_out_pad), cd),
        in_specs=[
            pl.BlockSpec((tm1, tk1), lambda i, j, k: (i, k)),
            pl.BlockSpec((tk1, tn), lambda i, j, k: (k, j)),
        ],
        out_specs=pl.BlockSpec((tm1, tn), lambda i, j, k: (i, j)),
        compiler_params=pltpu.CompilerParams(
            dimension_semantics=("parallel", "parallel", "arbitrary"),
            vmem_limit_bytes=_VMEM_LIMIT_BYTES,
        ),
    )
    if gk1 == 1:
        support = pl.pallas_call(
            _support_kernel, grid=(gi1, gj1, 1), **common1)(xp, wp)
    else:
        support = pl.pallas_call(
            _support_kernel_ktiled, grid=(gi1, gj1, gk1),
            scratch_shapes=[pltpu.VMEM((tm1, tn), jnp.float32)],
            **common1)(xp, wp)

    # Stage 2: out = adj @ support + bias  (reduction axis last)
    gi, gj, gk = n_rows_pad // tm, f_out_pad // tn, n_cols_pad // tk

    flops = 2 * n_rows_pad * n_cols_pad * f_out_pad
    bytes_accessed = (
        gj * n_rows_pad * n_cols_pad * itemsize    # adj re-read per f_out tile
        + gi * n_cols_pad * f_out_pad * itemsize   # support re-read per row tile
        + n_rows_pad * f_out_pad * 4               # output write
        + f_out_pad * 4                            # bias
    )

    out = pl.pallas_call(
        _aggregate_kernel,
        out_shape=jax.ShapeDtypeStruct((n_rows_pad, f_out_pad), jnp.float32),
        grid=(gi, gj, gk),
        in_specs=[
            pl.BlockSpec((tm, tk), lambda i, j, k: (i, k)),        # adj tile
            pl.BlockSpec((tk, tn), lambda i, j, k: (k, j)),        # support tile
            pl.BlockSpec((1, tn), lambda i, j, k: (0, j)),         # bias tile
        ],
        out_specs=pl.BlockSpec((tm, tn), lambda i, j, k: (i, j)),
        compiler_params=pltpu.CompilerParams(
            dimension_semantics=("parallel", "parallel", "arbitrary"),
            vmem_limit_bytes=_VMEM_LIMIT_BYTES,
        ),
        cost_estimate=pl.CostEstimate(
            flops=int(flops), transcendentals=0,
            bytes_accessed=int(bytes_accessed),
        ),
    )(adj_prepared, support, bp)

    return out[:n, :f_out]


def init_params(key, in_features, out_features, bias=True):
    """Matches GraphConvolution.reset_parameters(): U(-stdv, stdv),
    stdv = 1/sqrt(out_features)."""
    stdv = 1.0 / math.sqrt(out_features)
    kw, kb = jax.random.split(key)
    weight = jax.random.uniform(
        kw, (in_features, out_features), jnp.float32, minval=-stdv, maxval=stdv
    )
    b = None
    if bias:
        b = jax.random.uniform(
            kb, (out_features,), jnp.float32, minval=-stdv, maxval=stdv
        )
    return weight, b


if __name__ == "__main__":
    key = jax.random.PRNGKey(0)
    k_x, k_adj, k_p, k_x2, k_adj2, k_p2 = jax.random.split(key, 6)

    def make_graph(k, n, thresh):
        raw = jax.random.uniform(k, (n, n), jnp.float32)
        a = (raw > thresh).astype(jnp.float32)
        a = jnp.maximum(a, a.T) + jnp.eye(n, dtype=jnp.float32)
        deg = jnp.sum(a, axis=1, keepdims=True)
        return a / deg  # D^-1 A (row normalization)

    # ---------------- Small graph: fused single-kernel path -----------------
    N, F_IN, F_OUT = 16, 32, 64
    x = jax.random.normal(k_x, (N, F_IN), jnp.float32)
    adj = make_graph(k_adj, N, 0.7)
    weight, bias = init_params(k_p, F_IN, F_OUT, bias=True)
    ref = adj @ (x @ weight) + bias[None, :]

    # Default bf16 operands, adj prepared once and reused (as across layers).
    plan = make_plan(N, F_IN, F_OUT)
    adj_prep = prepare_adj(adj, plan)
    out = jax.block_until_ready(
        graph_convolution(x, None, weight, bias, plan=plan, adj_prepared=adj_prep)
    )
    assert out.shape == (N, F_OUT)
    assert jnp.allclose(out, ref, atol=3e-2, rtol=3e-2)

    # f32-operand path (exact vs. reference).
    out_f32 = jax.block_until_ready(
        graph_convolution(x, adj, weight, bias, compute_dtype=jnp.float32)
    )
    assert out_f32.shape == (N, F_OUT)
    assert jnp.allclose(out_f32, ref, atol=1e-5, rtol=1e-5)

    # ------------- Larger graph: tiled two-stage path (bf16) ----------------
    N2, F_IN2, F_OUT2 = 1100, 200, 140
    x2 = jax.random.normal(k_x2, (N2, F_IN2), jnp.float32)
    adj2 = make_graph(k_adj2, N2, 0.9)
    w2, b2 = init_params(k_p2, F_IN2, F_OUT2, bias=True)
    ref2 = adj2 @ (x2 @ w2) + b2[None, :]

    plan2 = make_plan(N2, F_IN2, F_OUT2)
    adj2_prep = prepare_adj(adj2, plan2)
    out2 = jax.block_until_ready(
        graph_convolution(x2, None, w2, b2, plan=plan2, adj_prepared=adj2_prep)
    )
    assert out2.shape == (N2, F_OUT2)
    assert jnp.allclose(out2, ref2, atol=2e-2, rtol=2e-2)

    print("KERNEL_OK")
</pallas_src>

<mosaic_0001>
module attributes {stable_mosaic.version = 11 : i64} {
  func.func @_fused_kernel(%arg0: i32, %arg1: memref<128x128xbf16, #tpu.memory_space<vmem>>, %arg2: memref<128x128xbf16, #tpu.memory_space<vmem>>, %arg3: memref<128x128xbf16, #tpu.memory_space<vmem>>, %arg4: memref<1x128xf32, #tpu.memory_space<vmem>>, %arg5: memref<128x128xf32, #tpu.memory_space<vmem>>, %arg6: memref<128x128xbf16, #tpu.memory_space<vmem>>) attributes {dimension_semantics = [#tpu.dimension_semantics<arbitrary>], iteration_bounds = array<i64: 1>, scalar_prefetch = 0 : i64, scratch_operands = 1 : i64, tpu.core_type = #tpu.core_type<tc>, window_params = [{pipeline_mode = #tpu.pipeline_mode<synchronous>, transform_indices = @transform_0, window_bounds = array<i64: 128, 128>}, {pipeline_mode = #tpu.pipeline_mode<synchronous>, transform_indices = @transform_1, window_bounds = array<i64: 128, 128>}, {pipeline_mode = #tpu.pipeline_mode<synchronous>, transform_indices = @transform_2, window_bounds = array<i64: 128, 128>}, {pipeline_mode = #tpu.pipeline_mode<synchronous>, transform_indices = @transform_3, window_bounds = array<i64: 1, 128>}, {pipeline_mode = #tpu.pipeline_mode<synchronous>, transform_indices = @transform_4, window_bounds = array<i64: 128, 128>}]} {
    %c0 = arith.constant 0 : index
    %c0_0 = arith.constant 0 : index
    %0 = vector.load %arg1[%c0, %c0_0] : memref<128x128xbf16, #tpu.memory_space<vmem>>, vector<128x128xbf16>
    %c0_1 = arith.constant 0 : index
    %c0_2 = arith.constant 0 : index
    %1 = vector.load %arg2[%c0_1, %c0_2] : memref<128x128xbf16, #tpu.memory_space<vmem>>, vector<128x128xbf16>
    %cst = arith.constant dense<0.000000e+00> : vector<128x128xf32>
    %2 = tpu.matmul %0, %1, %cst {dimension_numbers = #tpu.dot_dimension_numbers<[1], [0], [0], [1], [0, 0, 1, 1], [], []>} : vector<128x128xbf16>, vector<128x128xbf16>, vector<128x128xf32> -> vector<128x128xf32>
    %3 = arith.truncf %2 : vector<128x128xf32> to vector<128x128xbf16>
    %c0_3 = arith.constant 0 : index
    %c0_4 = arith.constant 0 : index
    %4 = vector.load %arg6[%c0_3, %c0_4] : memref<128x128xbf16, #tpu.memory_space<vmem>>, vector<128x128xbf16>
    tpu.vector_store %arg6[%c0_3, %c0_4], %3 {strides = array<i32>} : memref<128x128xbf16, #tpu.memory_space<vmem>>, vector<128x128xbf16>,
    %c0_5 = arith.constant 0 : index
    %c0_6 = arith.constant 0 : index
    %5 = vector.load %arg3[%c0_5, %c0_6] : memref<128x128xbf16, #tpu.memory_space<vmem>>, vector<128x128xbf16>
    %c0_7 = arith.constant 0 : index
    %c0_8 = arith.constant 0 : index
    %6 = vector.load %arg6[%c0_7, %c0_8] : memref<128x128xbf16, #tpu.memory_space<vmem>>, vector<128x128xbf16>
    %cst_9 = arith.constant dense<0.000000e+00> : vector<128x128xf32>
    %7 = tpu.matmul %5, %6, %cst_9 {dimension_numbers = #tpu.dot_dimension_numbers<[1], [0], [0], [1], [0, 0, 1, 1], [], []>} : vector<128x128xbf16>, vector<128x128xbf16>, vector<128x128xf32> -> vector<128x128xf32>
    %c0_10 = arith.constant 0 : index
    %c0_11 = arith.constant 0 : index
    %8 = vector.load %arg4[%c0_10, %c0_11] : memref<1x128xf32, #tpu.memory_space<vmem>>, vector<1x128xf32>
    %9 = vector.broadcast %8 : vector<1x128xf32> to vector<128x128xf32>
    %10 = arith.addf %7, %9 : vector<128x128xf32>
    %c0_12 = arith.constant 0 : index
    %c0_13 = arith.constant 0 : index
    %11 = vector.load %arg5[%c0_12, %c0_13] : memref<128x128xf32, #tpu.memory_space<vmem>>, vector<128x128xf32>
    tpu.vector_store %arg5[%c0_12, %c0_13], %10 {strides = array<i32>} : memref<128x128xf32, #tpu.memory_space<vmem>>, vector<128x128xf32>,
    return
  }
  func.func @transform_0(%arg0: i32) -> (i32, i32) {
    %c0_i32 = arith.constant 0 : i32
    %c0_i32_0 = arith.constant 0 : i32
    %c0_i32_1 = arith.constant 0 : i32
    return %c0_i32, %c0_i32_0 : i32, i32
  }
  func.func @transform_1(%arg0: i32) -> (i32, i32) {
    %c0_i32 = arith.constant 0 : i32
    %c0_i32_0 = arith.constant 0 : i32
    %c0_i32_1 = arith.constant 0 : i32
    return %c0_i32, %c0_i32_0 : i32, i32
  }
  func.func @transform_2(%arg0: i32) -> (i32, i32) {
    %c0_i32 = arith.constant 0 : i32
    %c0_i32_0 = arith.constant 0 : i32
    %c0_i32_1 = arith.constant 0 : i32
    return %c0_i32, %c0_i32_0 : i32, i32
  }
  func.func @transform_3(%arg0: i32) -> (i32, i32) {
    %c0_i32 = arith.constant 0 : i32
    %c0_i32_0 = arith.constant 0 : i32
    %c0_i32_1 = arith.constant 0 : i32
    return %c0_i32, %c0_i32_0 : i32, i32
  }
  func.func @transform_4(%arg0: i32) -> (i32, i32) {
    %c0_i32 = arith.constant 0 : i32
    %c0_i32_0 = arith.constant 0 : i32
    %c0_i32_1 = arith.constant 0 : i32
    return %c0_i32, %c0_i32_0 : i32, i32
  }
}

</mosaic_0001>

<bundles_post_ra>
// kernel: tpu_custom_call.1
= control target key start
LH: loop header
LB: loop body
LE: loop exit
PB: predicated region body
PF: predicated region fallthrough
CT: control target
= control target key end

     0   :  { %9 = vsyncpa [#allocation4], 0  ;;  %s873_s0 = inlined_call_operand.hbm [shape: bf16[128,128], index: 0, kind: input, shape index: {}]   ;;  %s874_s1 = inlined_call_operand.hbm [shape: bf16[128,128], index: 1, kind: input, shape index: {}]   ;;  %s875_s2 = inlined_call_operand.hbm [shape: bf16[128,128], index: 2, kind: input, shape index: {}]   ;;  %s876_s3 = inlined_call_operand.vmem [shape: f32[1,128], index: 3, kind: input, shape index: {}]   ;;  %s877_s4 = inlined_call_operand.hbm [shape: f32[128,128], index: 4, kind: output, shape index: {}]  }
   0x1   :  { %10 = vsyncpa [#allocation7], 0 }
   0x2   :  { %11 = vsyncpa [#allocation5], 0  ;;  %s29_s17 = sshll.u32 %s874_s1, 4  ;;  %s825_s18 = smov [#allocation6]   ;;  %s30_s17 = int_to_ptr.hbm [resolvable:$true] %s29_s17 }
   0x3   :  { %s31_s19 = sshll.u32 %s825_s18, 4  ;;  %s16_s22 = sshll.u32 %s873_s0, 4  ;;  %s32_s19 = int_to_ptr.vmem [resolvable:$true] %s31_s19  ;;  %s17_s22 = int_to_ptr.hbm [resolvable:$true] %s16_s22 }
   0x4   :  { %s826_s23 = smov 64   ;;  %s827_s24 = smov 4  }
   0x5   :  { %37 = dma.hbm_to_vmem [thread:$0]  %s30_s17, 1024, %s32_s19, [#allocation7], %s826_s23, %s826_s23, %s827_s24  }
   0x6   :  { %s828_s25 = smov [#allocation3]   ;;  %s42_s29 = sshll.u32 %s875_s2, 4  ;;  %s43_s29 = int_to_ptr.hbm [resolvable:$true] %s42_s29 }
   0x7   :  { %s18_s26 = sshll.u32 %s828_s25, 4  ;;  %s829_s1 = smov [#allocation8]   ;;  %s19_s26 = int_to_ptr.vmem [resolvable:$true] %s18_s26 }
   0x8   :  { %24 = dma.hbm_to_vmem [thread:$0]  %s17_s22, 1024, %s19_s26, [#allocation4], %s826_s23, %s826_s23, %s827_s24  }
   0x9   :  { %s44_s30 = sshll.u32 %s829_s1, 4  ;;  %s45_s30 = int_to_ptr.vmem [resolvable:$true] %s44_s30 }
   0xa   :  { %50 = dma.hbm_to_vmem [thread:$0]  %s43_s29, 1024, %s45_s30, [#allocation7], %s826_s23, %s826_s23, %s827_s24  }
   0xb   :  { %819 = dma.done.wait [#allocation4], 1024  }
   0xc   :  { %820 = vsyncadd [#allocation4], 4294966272 }
   0xd   :  { %821 = dma.done.wait [#allocation7], 2048  }
   0xe   :  { %822 = vsyncadd [#allocation7], 4294965248  ;;  %v634_v0 = vld [vmem:[#allocation6 + $0x38] sm:$0xff]  ;;  %v633_v1 = vld [vmem:[#allocation6 + $0x30] sm:$0xff]  ;;  %s477_s8 = sshll.u32 %s877_s4, 4  ;;  %s831_s9 = smov 128   ;;  %s478_s8 = int_to_ptr.hbm [resolvable:$true] %s477_s8 }
   0xf   :  { %698 = vmatpush.bf16.msra.mxu2 %v634_v0  ;;  %193 = vmatpush.bf16.msra.mxu0 %v634_v0  ;;  %v632_v2 = vld [vmem:[#allocation6 + $0x28] sm:$0xff]  ;;  %v631_v3 = vld [vmem:[#allocation6 + $0x20] sm:$0xff]  ;;  %v630_v4 = vld [vmem:[#allocation6 + $0x18] sm:$0xff]  ;;  %s832_s10 = smov 8  }
  0x10   :  { %v629_v5 = vld [vmem:[#allocation6 + $0x10] sm:$0xff]  ;;  %v628_v6 = vld [vmem:[#allocation6 + $0x8] sm:$0xff]  ;;  %v627_v7 = vld [vmem:[#allocation6] sm:$0xff] }
  0x11   :  { %v623_v8 = vld [vmem:[#allocation3 + $0x20] sm:$0xff]  ;;  %v624_v10 = vld [vmem:[#allocation3 + $0x28] sm:$0xff]  ;;  %v625_v12 = vld [vmem:[#allocation3 + $0x30] sm:$0xff] }
  0x12   :  { %v619_v9 = vld [vmem:[#allocation3] sm:$0xff]  ;;  %v620_v11 = vld [vmem:[#allocation3 + $0x8] sm:$0xff]  ;;  %v621_v13 = vld [vmem:[#allocation3 + $0x10] sm:$0xff] }
  0x13   :  { %699 = vmatpush.bf16.msra.mxu2 %v633_v1  ;;  %194 = vmatpush.bf16.msra.mxu0 %v633_v1  ;;  %v626_v14 = vld [vmem:[#allocation3 + $0x38] sm:$0xff]  ;;  %v635_v48 = vld [vmem:[#allocation8] sm:$0xff]  ;;  %v636_v50 = vld [vmem:[#allocation8 + $0x8] sm:$0xff] }
  0x14   :  { %v622_v15 = vld [vmem:[#allocation3 + $0x18] sm:$0xff]  ;;  %v639_v49 = vld [vmem:[#allocation8 + $0x20] sm:$0xff]  ;;  %v640_v51 = vld [vmem:[#allocation8 + $0x28] sm:$0xff] }
  0x15   :  { %v637_v52 = vld [vmem:[#allocation8 + $0x10] sm:$0xff]  ;;  %v638_v54 = vld [vmem:[#allocation8 + $0x18] sm:$0xff]  ;;  %v722_v56 = vld [vmem:[%s876_s3] ss:$0 sm:$0xff]  ;;  %s830_s3 = smov [#allocation9]  }
  0x16   :  { %v641_v53 = vld [vmem:[#allocation8 + $0x30] sm:$0xff]  ;;  %v642_v55 = vld [vmem:[#allocation8 + $0x38] sm:$0xff]  ;;  %s475_s5 = sshll.u32 %s830_s3, 4  ;;  %s476_s5 = int_to_ptr.vmem [resolvable:$true] %s475_s5 }
  0x17   :  { %700 = vmatpush.bf16.msra.mxu2 %v632_v2  ;;  %195 = vmatpush.bf16.msra.mxu0 %v632_v2 }
  0x1b   :  { %701 = vmatpush.bf16.msra.mxu2 %v631_v3  ;;  %196 = vmatpush.bf16.msra.mxu0 %v631_v3 }
  0x1f   :  { %702 = vmatpush.bf16.msra.mxu2 %v630_v4  ;;  %197 = vmatpush.bf16.msra.mxu0 %v630_v4 }
  0x23   :  { %703 = vmatpush.bf16.msra.mxu2 %v629_v5  ;;  %198 = vmatpush.bf16.msra.mxu0 %v629_v5 }
  0x27   :  { %704 = vmatpush.bf16.msra.mxu2 %v628_v6  ;;  %199 = vmatpush.bf16.msra.mxu0 %v628_v6 }
  0x2b   :  { %705 = vmatpush.bf16.msra.mxu2 %v627_v7  ;;  %200 = vmatpush.bf16.msra.mxu0 %v627_v7 }
  0x2e   :  { %221 = vmatmul.bf16.vlgmr.msra.gmra.mxu2 %v623_v8  ;;  %201 = vmatmul.bf16.vlgmr.msra.gmra.mxu0 %v619_v9 }
  0x3e   :  { %226 = vmatmul.bf16.gmra.mxu2 %v624_v10  ;;  %206 = vmatmul.bf16.gmra.mxu0 %v620_v11 }
  0x4e   :  { %231 = vmatmul.bf16.gmra.mxu2 %v625_v12  ;;  %211 = vmatmul.bf16.gmra.mxu0 %v621_v13 }
  0x5e   :  { %236 = vmatmul.bf16.gmra.mxu2 %v626_v14  ;;  %216 = vmatmul.bf16.gmra.mxu0 %v622_v15 }
  0xab   :  { %v202_v16 = vpop.f32.mrf.mxu0 }
  0xb1   :  { %v222_v17 = vpop.f32.mrf.mxu2 }
  0xb3   :  { %v204_v18 = vpop.f32.mrf.mxu0 }
  0xb4   :  { %v654_v19 = vpack.c.bf16 %v204_v18, %v202_v16 }
  0xb6   :  { %655 = vst [vmem:[#allocation2 + $0x30] sm:$0xff] %v654_v19  }
  0xb9   :  { %v224_v20 = vpop.f32.mrf.mxu2 }
  0xba   :  { %v674_v21 = vpack.c.bf16 %v224_v20, %v222_v17 }
  0xbb   :  { %v207_v22 = vpop.f32.mrf.mxu0 }
  0xbc   :  { %694 = vst [vmem:[#allocation2 + $0x8] sm:$0xff] %v674_v21  }
  0xbd   :  { %v643_v47 = vld [vmem:[#allocation2 + $0x30] sm:$0xff] }
  0xc1   :  { %v227_v23 = vpop.f32.mrf.mxu2 }
  0xc3   :  { %v209_v24 = vpop.f32.mrf.mxu0  ;;  %v647_v43 = vld [vmem:[#allocation2 + $0x8] sm:$0xff] }
  0xc4   :  { %v659_v25 = vpack.c.bf16 %v209_v24, %v207_v22 }
  0xc6   :  { %691 = vst [vmem:[#allocation2] sm:$0xff] %v659_v25  }
  0xc9   :  { %v229_v26 = vpop.f32.mrf.mxu2 }
  0xca   :  { %v679_v27 = vpack.c.bf16 %v229_v26, %v227_v23 }
  0xcb   :  { %v212_v28 = vpop.f32.mrf.mxu0 }
  0xcc   :  { %695 = vst [vmem:[#allocation2 + $0x20] sm:$0xff] %v679_v27  }
  0xcd   :  { %v644_v46 = vld [vmem:[#allocation2] sm:$0xff] }
  0xd1   :  { %v232_v29 = vpop.f32.mrf.mxu2 }
  0xd3   :  { %v214_v30 = vpop.f32.mrf.mxu0  ;;  %v648_v42 = vld [vmem:[#allocation2 + $0x20] sm:$0xff] }
  0xd4   :  { %v664_v31 = vpack.c.bf16 %v214_v30, %v212_v28 }
  0xd6   :  { %692 = vst [vmem:[#allocation2 + $0x18] sm:$0xff] %v664_v31  }
  0xd9   :  { %v234_v32 = vpop.f32.mrf.mxu2 }
  0xda   :  { %v684_v33 = vpack.c.bf16 %v234_v32, %v232_v29 }
  0xdb   :  { %v217_v34 = vpop.f32.mrf.mxu0 }
  0xdc   :  { %696 = vst [vmem:[#allocation2 + $0x28] sm:$0xff] %v684_v33  }
  0xdd   :  { %v645_v45 = vld [vmem:[#allocation2 + $0x18] sm:$0xff] }
  0xe1   :  { %v237_v35 = vpop.f32.mrf.mxu2 }
  0xe3   :  { %v219_v36 = vpop.f32.mrf.mxu0  ;;  %v649_v41 = vld [vmem:[#allocation2 + $0x28] sm:$0xff] }
  0xe4   :  { %v669_v37 = vpack.c.bf16 %v219_v36, %v217_v34 }
  0xe6   :  { %693 = vst [vmem:[#allocation2 + $0x10] sm:$0xff] %v669_v37  }
  0xe9   :  { %v239_v38 = vpop.f32.mrf.mxu2 }
  0xea   :  { %v689_v39 = vpack.c.bf16 %v239_v38, %v237_v35 }
  0xec   :  { %697 = vst [vmem:[#allocation2 + $0x38] sm:$0xff] %v689_v39  }
  0xed   :  { %v646_v44 = vld [vmem:[#allocation2 + $0x10] sm:$0xff] }
  0xf3   :  { %v650_v40 = vld [vmem:[#allocation2 + $0x38] sm:$0xff] }
  0xf4   :  { %406 = vmatpush.bf16.msra.mxu1 %v650_v40  ;;  %706 = vmatpush.bf16.msra.mxu3 %v650_v40 }
  0xf8   :  { %407 = vmatpush.bf16.msra.mxu1 %v649_v41  ;;  %707 = vmatpush.bf16.msra.mxu3 %v649_v41 }
  0xfc   :  { %408 = vmatpush.bf16.msra.mxu1 %v648_v42  ;;  %708 = vmatpush.bf16.msra.mxu3 %v648_v42 }
 0x100   :  { %409 = vmatpush.bf16.msra.mxu1 %v647_v43  ;;  %709 = vmatpush.bf16.msra.mxu3 %v647_v43 }
 0x104   :  { %410 = vmatpush.bf16.msra.mxu1 %v646_v44  ;;  %710 = vmatpush.bf16.msra.mxu3 %v646_v44 }
 0x108   :  { %411 = vmatpush.bf16.msra.mxu1 %v645_v45  ;;  %711 = vmatpush.bf16.msra.mxu3 %v645_v45 }
 0x10c   :  { %412 = vmatpush.bf16.msra.mxu1 %v644_v46  ;;  %712 = vmatpush.bf16.msra.mxu3 %v644_v46 }
 0x110   :  { %413 = vmatpush.bf16.msra.mxu1 %v643_v47  ;;  %713 = vmatpush.bf16.msra.mxu3 %v643_v47 }
 0x113   :  { %414 = vmatmul.bf16.vlgmr.msra.gmra.mxu1 %v635_v48  ;;  %434 = vmatmul.bf16.vlgmr.msra.gmra.mxu3 %v639_v49 }
 0x123   :  { %419 = vmatmul.bf16.gmra.mxu1 %v636_v50  ;;  %439 = vmatmul.bf16.gmra.mxu3 %v640_v51 }
 0x133   :  { %424 = vmatmul.bf16.gmra.mxu1 %v637_v52  ;;  %444 = vmatmul.bf16.gmra.mxu3 %v641_v53 }
 0x143   :  { %429 = vmatmul.bf16.gmra.mxu1 %v638_v54  ;;  %449 = vmatmul.bf16.gmra.mxu3 %v642_v55 }
 0x190   :  { %v415_v57 = vpop.f32.mrf.mxu1 }
 0x191   :  { %v416_v58 = vadd.f32 %v722_v56, %v415_v57 }
 0x193   :  { %455 = vst [vmem:[#allocation9] sm:$0xff] %v416_v58 }
 0x196   :  { %v435_v59 = vpop.f32.mrf.mxu3 }
 0x197   :  { %v436_v60 = vadd.f32 %v722_v56, %v435_v59 }
 0x198   :  { %v417_v61 = vpop.f32.mrf.mxu1 }
 0x199   :  { %463 = vst [vmem:[#allocation9 + $0x40] sm:$0xff] %v436_v60  ;;  %v418_v62 = vadd.f32 %v722_v56, %v417_v61 }
 0x19b   :  { %456 = vst [vmem:[#allocation9 + $0x8] sm:$0xff] %v418_v62 }
 0x19e   :  { %v437_v63 = vpop.f32.mrf.mxu3 }
 0x19f   :  { %v438_v0 = vadd.f32 %v722_v56, %v437_v63 }
 0x1a0   :  { %v420_v1 = vpop.f32.mrf.mxu1 }
 0x1a1   :  { %464 = vst [vmem:[#allocation9 + $0x48] sm:$0xff] %v438_v0  ;;  %v421_v2 = vadd.f32 %v722_v56, %v420_v1 }
 0x1a3   :  { %457 = vst [vmem:[#allocation9 + $0x10] sm:$0xff] %v421_v2 }
 0x1a6   :  { %v440_v3 = vpop.f32.mrf.mxu3 }
 0x1a7   :  { %v441_v4 = vadd.f32 %v722_v56, %v440_v3 }
 0x1a8   :  { %v422_v5 = vpop.f32.mrf.mxu1 }
 0x1a9   :  { %465 = vst [vmem:[#allocation9 + $0x50] sm:$0xff] %v441_v4  ;;  %v423_v6 = vadd.f32 %v722_v56, %v422_v5 }
 0x1ab   :  { %458 = vst [vmem:[#allocation9 + $0x18] sm:$0xff] %v423_v6 }
 0x1ae   :  { %v442_v7 = vpop.f32.mrf.mxu3 }
 0x1af   :  { %v443_v8 = vadd.f32 %v722_v56, %v442_v7 }
 0x1b0   :  { %v425_v9 = vpop.f32.mrf.mxu1 }
 0x1b1   :  { %466 = vst [vmem:[#allocation9 + $0x58] sm:$0xff] %v443_v8  ;;  %v426_v10 = vadd.f32 %v722_v56, %v425_v9 }
 0x1b3   :  { %459 = vst [vmem:[#allocation9 + $0x20] sm:$0xff] %v426_v10 }
 0x1b6   :  { %v445_v11 = vpop.f32.mrf.mxu3 }
 0x1b7   :  { %v446_v12 = vadd.f32 %v722_v56, %v445_v11 }
 0x1b8   :  { %v427_v13 = vpop.f32.mrf.mxu1 }
 0x1b9   :  { %467 = vst [vmem:[#allocation9 + $0x60] sm:$0xff] %v446_v12  ;;  %v428_v14 = vadd.f32 %v722_v56, %v427_v13 }
 0x1bb   :  { %460 = vst [vmem:[#allocation9 + $0x28] sm:$0xff] %v428_v14 }
 0x1be   :  { %v447_v15 = vpop.f32.mrf.mxu3 }
 0x1bf   :  { %v448_v16 = vadd.f32 %v722_v56, %v447_v15 }
 0x1c0   :  { %v430_v17 = vpop.f32.mrf.mxu1 }
 0x1c1   :  { %468 = vst [vmem:[#allocation9 + $0x68] sm:$0xff] %v448_v16  ;;  %v431_v18 = vadd.f32 %v722_v56, %v430_v17 }
 0x1c3   :  { %461 = vst [vmem:[#allocation9 + $0x30] sm:$0xff] %v431_v18 }
 0x1c6   :  { %v450_v19 = vpop.f32.mrf.mxu3 }
 0x1c7   :  { %v451_v20 = vadd.f32 %v722_v56, %v450_v19 }
 0x1c8   :  { %v432_v21 = vpop.f32.mrf.mxu1 }
 0x1c9   :  { %469 = vst [vmem:[#allocation9 + $0x70] sm:$0xff] %v451_v20  ;;  %v433_v22 = vadd.f32 %v722_v56, %v432_v21 }
 0x1cb   :  { %462 = vst [vmem:[#allocation9 + $0x38] sm:$0xff] %v433_v22 }
 0x1ce   :  { %v452_v23 = vpop.f32.mrf.mxu3 }
 0x1cf   :  { %v453_v24 = vadd.f32 %v722_v56, %v452_v23 }
 0x1d1   :  { %470 = vst [vmem:[#allocation9 + $0x78] sm:$0xff] %v453_v24 }
 0x1d2   :  { %483 = dma.vmem_to_hbm [thread:$0]  %s476_s5, 2048, %s478_s8, [#allocation5], %s831_s9, %s831_s9, %s832_s10  }
 0x1d3   :  { %823 = dma.done.wait [#allocation5], 2048  }
 0x1d4   :  { %824 = vsyncadd [#allocation5], 4294965248 }
 0x1d5   :  { %488 = vsyncpa [#allocation4], 1 }
 0x1d6   :  { %489 = vsyncpa [#allocation7], 1 }
 0x1d7   :  { %490 = vsyncpa [#allocation5], 1 }

</bundles_post_ra>
